<compile_context>
chip_gen: v7x
topology: tpu7x:2x2x1
jax: 0.10.0
libtpu: 0.0.40
codegen_flags: <defaults>
</compile_context>

<pallas_src>
import functools

import jax
import jax.numpy as jnp
import numpy as np
from jax.experimental import pallas as pl
from jax.experimental.pallas import tpu as pltpu


def _round_up(x, m):
    return ((x + m - 1) // m) * m


def _conv1d_ncl_kernel(x_hbm, w_ref, b_ref, o_ref, xwin, sem, *,
                       k_size, dilation, l_tile, win):
    """One (batch element, L tile) block per grid step, NCL layout.

    x_hbm : (N, C_in_pad, L_buf)      padded input, left in HBM (pl.ANY)
    w_ref : (K, C_out_pad, C_in_pad)  weights, constant block in VMEM
    b_ref : (C_out_pad, 1)            bias, f32
    o_ref : (1, C_out_pad, L_TILE)    output tile (already NCL)
    xwin  : (2, C_in_pad, win)        double-buffered input-window scratch
    sem   : (2,)                      DMA semaphores
    """
    n = pl.program_id(0)
    j = pl.program_id(1)
    n_lt = pl.num_programs(1)
    slot = j % 2

    def window_copy(jj, sl):
        start = pl.multiple_of(jj * l_tile, 128)
        return pltpu.make_async_copy(
            x_hbm.at[n, :, pl.ds(start, win)], xwin.at[sl], sem.at[sl])

    # First tile of this batch row primes its own fetch.  Grid axis 1 is
    # "arbitrary", so a core always starts a batch row at j == 0 and every
    # wait below is matched by a start (no cross-core hazards).
    @pl.when(j == 0)
    def _():
        window_copy(j, slot).start()

    # Prefetch the next tile's window while this one computes.
    @pl.when(j + 1 < n_lt)
    def _():
        window_copy(j + 1, 1 - slot).start()

    window_copy(j, slot).wait()

    c_out_pad, l_t = o_ref.shape[1], o_ref.shape[2]
    # Accumulator starts at the broadcast bias (saves a separate VPU pass).
    acc = jnp.broadcast_to(b_ref[...].astype(jnp.float32), (c_out_pad, l_t))
    for k in range(k_size):
        off = k * dilation                        # static lane offset
        slab = xwin[slot, :, pl.ds(off, l_t)]     # (C_in_pad, L_TILE)
        acc = acc + jnp.dot(w_ref[k], slab,
                            preferred_element_type=jnp.float32)
    o_ref[0] = acc.astype(o_ref.dtype)


def conv_norm_forward(x, weight, bias=None, *, stride=1, padding=None,
                      dilation=1, compute_dtype=None, l_tile=512):
    """Equivalent of ConvNorm.forward (torch.nn.Conv1d, stride=1).

    x:      (N, C_in, L)      float32   (PyTorch NCL layout, kept throughout)
    weight: (C_out, C_in, K)  float32   (PyTorch Conv1d layout)
    bias:   (C_out,) or None
    returns (N, C_out, L_out)           (NCL, same as PyTorch)
    """
    assert stride == 1, "ConvNorm in AutoVC always uses stride=1"
    N, C_in, L = x.shape
    C_out, C_in_w, K = weight.shape
    assert C_in_w == C_in

    if padding is None:
        assert K % 2 == 1
        padding = int(dilation * (K - 1) / 2)

    halo = dilation * (K - 1)
    L_out = L + 2 * padding - halo
    assert L_out > 0

    out_dtype = x.dtype
    if compute_dtype is None:
        compute_dtype = x.dtype
    compute_dtype = jnp.dtype(compute_dtype)
    sub = 16 if compute_dtype.itemsize == 2 else 8      # sublane quantum

    # --- tiling -----------------------------------------------------------
    L_TILE = min(_round_up(l_tile, 128), _round_up(L_out, 128))
    n_lt = -(-L_out // L_TILE)
    L_out_pad = n_lt * L_TILE
    HALO_PAD = _round_up(halo, 128) if halo > 0 else 0   # lane-aligned halo
    W = L_TILE + HALO_PAD                                # window width
    L_buf = L_out_pad + HALO_PAD                         # padded HBM length

    C_in_pad = _round_up(C_in, sub)                      # sublane-only pad
    C_out_pad = _round_up(C_out, sub)

    # --- wrapper glue: one pad pass, no transposes --------------------------
    right_pad = L_buf - padding - L                      # provably >= 0
    x_pad = jnp.pad(x.astype(compute_dtype),
                    ((0, 0), (0, C_in_pad - C_in), (padding, right_pad)))

    # (C_out, C_in, K) -> (K, C_out_pad, C_in_pad)
    w = jnp.transpose(weight, (2, 0, 1)).astype(compute_dtype)
    w = jnp.pad(w, ((0, 0), (0, C_out_pad - C_out), (0, C_in_pad - C_in)))

    if bias is None:
        bias = jnp.zeros((C_out,), jnp.float32)
    b2d = jnp.pad(bias.astype(jnp.float32),
                  (0, C_out_pad - C_out)).reshape(C_out_pad, 1)

    kernel = functools.partial(_conv1d_ncl_kernel, k_size=K, dilation=dilation,
                               l_tile=L_TILE, win=W)

    # Scoped-VMEM budget from the actual footprint (v5e default is 16 MiB,
    # v7x has only 64 MiB physical) with 2x headroom, clamped to a safe range.
    cbytes = compute_dtype.itemsize
    est = (2 * C_in_pad * W * cbytes                      # input window x2
           + 2 * K * C_out_pad * C_in_pad * cbytes        # weights (dbl-buf)
           + 2 * C_out_pad * L_TILE * jnp.dtype(out_dtype).itemsize
           + 2 * C_out_pad * L_TILE * 4                   # f32 accumulator
           + 4 * C_out_pad)
    vmem_limit = int(min(max(32 * 2**20, 2 * est), 56 * 2**20))

    out_pad = pl.pallas_call(
        kernel,
        out_shape=jax.ShapeDtypeStruct((N, C_out_pad, L_out_pad), out_dtype),
        grid_spec=pltpu.PrefetchScalarGridSpec(
            num_scalar_prefetch=0,
            grid=(N, n_lt),
            in_specs=[
                # padded input stays in HBM; windows fetched manually
                pl.BlockSpec(memory_space=pl.ANY),
                # weights + bias: constant blocks
                pl.BlockSpec((K, C_out_pad, C_in_pad), lambda n, j: (0, 0, 0)),
                pl.BlockSpec((C_out_pad, 1), lambda n, j: (0, 0)),
            ],
            out_specs=pl.BlockSpec((1, C_out_pad, L_TILE),
                                   lambda n, j: (n, 0, j)),
            scratch_shapes=[
                pltpu.VMEM((2, C_in_pad, W), compute_dtype),
                pltpu.SemaphoreType.DMA((2,)),
            ],
        ),
        compiler_params=pltpu.CompilerParams(
            dimension_semantics=("parallel", "arbitrary"),
            vmem_limit_bytes=vmem_limit),
    )(x_pad, w, b2d)

    return out_pad[:, :C_out, :L_out]                     # already NCL


def make_conv_norm_params(key, in_channels, out_channels, kernel_size,
                          w_init_gain="linear"):
    """xavier_uniform_ init matching torch.nn.init (gain('linear') == 1)."""
    gain = 1.0
    fan_in = in_channels * kernel_size
    fan_out = out_channels * kernel_size
    bound = gain * np.sqrt(6.0 / (fan_in + fan_out))
    k_w, k_b = jax.random.split(key)
    weight = jax.random.uniform(
        k_w, (out_channels, in_channels, kernel_size),
        minval=-bound, maxval=bound, dtype=jnp.float32)
    b_bound = 1.0 / np.sqrt(fan_in)
    bias = jax.random.uniform(
        k_b, (out_channels,), minval=-b_bound, maxval=b_bound,
        dtype=jnp.float32)
    return weight, bias


def _reference_conv1d(x, weight, bias, padding, dilation):
    """Pure-JAX reference (lax conv) for correctness checking."""
    out = jax.lax.conv_general_dilated(
        x, weight,
        window_strides=(1,),
        padding=[(padding, padding)],
        rhs_dilation=(dilation,),
        dimension_numbers=("NCH", "OIH", "NCH"),
    )
    return out + bias[None, :, None]


if __name__ == "__main__":
    key = jax.random.PRNGKey(0)
    k_x1, k_p1, k_x2, k_p2, k_x3, k_p3 = jax.random.split(key, 6)

    # 1) Thin channels, single L tile, f32.
    N, C_in, C_out, L, K = 2, 8, 8, 16, 5
    x = jax.random.normal(k_x1, (N, C_in, L), dtype=jnp.float32)
    w, b = make_conv_norm_params(k_p1, C_in, C_out, K)
    out = jax.block_until_ready(conv_norm_forward(x, w, b))
    ref = _reference_conv1d(x, w, b, padding=(K - 1) // 2, dilation=1)
    np.testing.assert_allclose(np.asarray(out), np.asarray(ref),
                               rtol=1e-5, atol=1e-5)

    # 2) Multi-tile L + dilation=2 (exercises the manual window DMA, the
    #    double-buffered prefetch and the halo), f32.
    N, C_in, C_out, L, K, dil = 2, 8, 16, 300, 5, 2
    pad = dil * (K - 1) // 2
    x = jax.random.normal(k_x2, (N, C_in, L), dtype=jnp.float32)
    w, b = make_conv_norm_params(k_p2, C_in, C_out, K)
    out = jax.block_until_ready(
        conv_norm_forward(x, w, b, dilation=dil, l_tile=128))
    ref = _reference_conv1d(x, w, b, padding=pad, dilation=dil)
    np.testing.assert_allclose(np.asarray(out), np.asarray(ref),
                               rtol=1e-5, atol=1e-5)

    # 3) AutoVC-like wider input channels, bf16 MXU operands (f32 accumulate).
    N, C_in, C_out, L, K = 1, 128, 8, 256, 3
    x = jax.random.normal(k_x3, (N, C_in, L), dtype=jnp.float32)
    w, b = make_conv_norm_params(k_p3, C_in, C_out, K)
    out = jax.block_until_ready(
        conv_norm_forward(x, w, b, compute_dtype=jnp.bfloat16, l_tile=128))
    ref = _reference_conv1d(x, w, b, padding=(K - 1) // 2, dilation=1)
    np.testing.assert_allclose(np.asarray(out), np.asarray(ref),
                               rtol=0.1, atol=0.1)

    print("KERNEL_OK")
</pallas_src>

<mosaic_0001>
module attributes {stable_mosaic.version = 11 : i64} {
  func.func @_conv1d_ncl_kernel(%arg0: i32, %arg1: i32, %arg2: memref<2x8x256xf32, #tpu.memory_space<any>>, %arg3: memref<5x8x8xf32, #tpu.memory_space<vmem>>, %arg4: memref<8x1xf32, #tpu.memory_space<vmem>>, %arg5: memref<1x8x128xf32, #tpu.memory_space<vmem>>, %arg6: memref<2x8x256xf32, #tpu.memory_space<vmem>>, %arg7: memref<2x!tpu.dma_semaphore, #tpu.memory_space<semaphore_mem>>) attributes {dimension_semantics = [#tpu.dimension_semantics<parallel>, #tpu.dimension_semantics<arbitrary>], iteration_bounds = array<i64: 2, 1>, scalar_prefetch = 0 : i64, scratch_operands = 2 : i64, tpu.core_type = #tpu.core_type<tc>, window_params = [{}, {pipeline_mode = #tpu.pipeline_mode<synchronous>, transform_indices = @transform_1, window_bounds = array<i64: 5, 8, 8>}, {pipeline_mode = #tpu.pipeline_mode<synchronous>, transform_indices = @transform_2, window_bounds = array<i64: 8, 1>}, {transform_indices = @transform_3, window_bounds = array<i64: 1, 8, 128>}]} {
    %c2_i32 = arith.constant 2 : i32
    %c0_i32 = arith.constant 0 : i32
    %0 = arith.cmpi eq, %c2_i32, %c0_i32 : i32
    %c1_i32 = arith.constant 1 : i32
    %1 = arith.select %0, %c1_i32, %c2_i32 : i32
    %2 = arith.remsi %arg1, %1 : i32
    %c0_i32_0 = arith.constant 0 : i32
    %3 = arith.cmpi ne, %2, %c0_i32_0 : i32
    %c0_i32_1 = arith.constant 0 : i32
    %4 = arith.cmpi slt, %2, %c0_i32_1 : i32
    %c0_i32_2 = arith.constant 0 : i32
    %5 = arith.cmpi slt, %1, %c0_i32_2 : i32
    %6 = arith.xori %4, %5 : i1
    %7 = arith.andi %6, %3 : i1
    %8 = arith.addi %2, %1 : i32
    %9 = arith.select %7, %8, %2 : i32
    %c0_i32_3 = arith.constant 0 : i32
    %10 = arith.cmpi eq, %arg1, %c0_i32_3 : i32
    %11 = arith.extui %10 : i1 to i32
    %c0_i32_4 = arith.constant 0 : i32
    %12 = arith.cmpi ne, %11, %c0_i32_4 : i32
    scf.if %12 {
      %c128_i32_40 = arith.constant 128 : i32
      %66 = arith.muli %arg1, %c128_i32_40 : i32
      %67 = tpu.assume_multiple %66, 128 : i32
      %c0_i32_41 = arith.constant 0 : i32
      %68 = tpu.memref_slice %arg2[%arg0, %c0_i32_41, %67] : memref<2x8x256xf32, #tpu.memory_space<any>> -> memref<1x8x256xf32, #tpu.memory_space<any>>
      %69 = tpu.memref_squeeze %68 : memref<1x8x256xf32, #tpu.memory_space<any>> -> memref<8x256xf32, #tpu.memory_space<any>>
      %c0_i32_42 = arith.constant 0 : i32
      %c0_i32_43 = arith.constant 0 : i32
      %70 = tpu.memref_slice %arg6[%9, %c0_i32_42, %c0_i32_43] : memref<2x8x256xf32, #tpu.memory_space<vmem>> -> memref<1x8x256xf32, #tpu.memory_space<vmem>>
      %71 = tpu.memref_squeeze %70 : memref<1x8x256xf32, #tpu.memory_space<vmem>> -> memref<8x256xf32, #tpu.memory_space<vmem>>
      %72 = tpu.memref_slice %arg7[%9] : memref<2x!tpu.dma_semaphore, #tpu.memory_space<semaphore_mem>> -> memref<1x!tpu.dma_semaphore, #tpu.memory_space<semaphore_mem>>
      %73 = tpu.memref_squeeze %72 : memref<1x!tpu.dma_semaphore, #tpu.memory_space<semaphore_mem>> -> memref<!tpu.dma_semaphore, #tpu.memory_space<semaphore_mem>>
      tpu.enqueue_dma source(%69 : memref<8x256xf32, #tpu.memory_space<any>>) target(%71 : memref<8x256xf32, #tpu.memory_space<vmem>>) target_semaphore(%73 : memref<!tpu.dma_semaphore, #tpu.memory_space<semaphore_mem>>)
    } else {
    }
    %c1_i32_5 = arith.constant 1 : i32
    %13 = arith.addi %arg1, %c1_i32_5 : i32
    %c1_i32_6 = arith.constant 1 : i32
    %14 = arith.cmpi slt, %13, %c1_i32_6 : i32
    %15 = arith.extui %14 : i1 to i32
    %c0_i32_7 = arith.constant 0 : i32
    %16 = arith.cmpi ne, %15, %c0_i32_7 : i32
    scf.if %16 {
      %c1_i32_40 = arith.constant 1 : i32
      %66 = arith.addi %arg1, %c1_i32_40 : i32
      %c1_i32_41 = arith.constant 1 : i32
      %67 = arith.subi %c1_i32_41, %9 : i32
      %c128_i32_42 = arith.constant 128 : i32
      %68 = arith.muli %66, %c128_i32_42 : i32
      %69 = tpu.assume_multiple %68, 128 : i32
      %c0_i32_43 = arith.constant 0 : i32
      %70 = tpu.memref_slice %arg2[%arg0, %c0_i32_43, %69] : memref<2x8x256xf32, #tpu.memory_space<any>> -> memref<1x8x256xf32, #tpu.memory_space<any>>
      %71 = tpu.memref_squeeze %70 : memref<1x8x256xf32, #tpu.memory_space<any>> -> memref<8x256xf32, #tpu.memory_space<any>>
      %c0_i32_44 = arith.constant 0 : i32
      %c0_i32_45 = arith.constant 0 : i32
      %72 = tpu.memref_slice %arg6[%67, %c0_i32_44, %c0_i32_45] : memref<2x8x256xf32, #tpu.memory_space<vmem>> -> memref<1x8x256xf32, #tpu.memory_space<vmem>>
      %73 = tpu.memref_squeeze %72 : memref<1x8x256xf32, #tpu.memory_space<vmem>> -> memref<8x256xf32, #tpu.memory_space<vmem>>
      %74 = tpu.memref_slice %arg7[%67] : memref<2x!tpu.dma_semaphore, #tpu.memory_space<semaphore_mem>> -> memref<1x!tpu.dma_semaphore, #tpu.memory_space<semaphore_mem>>
      %75 = tpu.memref_squeeze %74 : memref<1x!tpu.dma_semaphore, #tpu.memory_space<semaphore_mem>> -> memref<!tpu.dma_semaphore, #tpu.memory_space<semaphore_mem>>
      tpu.enqueue_dma source(%71 : memref<8x256xf32, #tpu.memory_space<any>>) target(%73 : memref<8x256xf32, #tpu.memory_space<vmem>>) target_semaphore(%75 : memref<!tpu.dma_semaphore, #tpu.memory_space<semaphore_mem>>)
    } else {
    }
    %c128_i32 = arith.constant 128 : i32
    %17 = arith.muli %arg1, %c128_i32 : i32
    %18 = tpu.assume_multiple %17, 128 : i32
    %c0_i32_8 = arith.constant 0 : i32
    %19 = tpu.memref_slice %arg2[%arg0, %c0_i32_8, %18] : memref<2x8x256xf32, #tpu.memory_space<any>> -> memref<1x8x256xf32, #tpu.memory_space<any>>
    %20 = tpu.memref_squeeze %19 : memref<1x8x256xf32, #tpu.memory_space<any>> -> memref<8x256xf32, #tpu.memory_space<any>>
    %c0_i32_9 = arith.constant 0 : i32
    %c0_i32_10 = arith.constant 0 : i32
    %21 = tpu.memref_slice %arg6[%9, %c0_i32_9, %c0_i32_10] : memref<2x8x256xf32, #tpu.memory_space<vmem>> -> memref<1x8x256xf32, #tpu.memory_space<vmem>>
    %22 = tpu.memref_squeeze %21 : memref<1x8x256xf32, #tpu.memory_space<vmem>> -> memref<8x256xf32, #tpu.memory_space<vmem>>
    %23 = tpu.memref_slice %arg7[%9] : memref<2x!tpu.dma_semaphore, #tpu.memory_space<semaphore_mem>> -> memref<1x!tpu.dma_semaphore, #tpu.memory_space<semaphore_mem>>
    %24 = tpu.memref_squeeze %23 : memref<1x!tpu.dma_semaphore, #tpu.memory_space<semaphore_mem>> -> memref<!tpu.dma_semaphore, #tpu.memory_space<semaphore_mem>>
    tpu.wait_dma2 semaphore(%24 : memref<!tpu.dma_semaphore, #tpu.memory_space<semaphore_mem>>) src(%20 : memref<8x256xf32, #tpu.memory_space<any>>) dst(%22 : memref<8x256xf32, #tpu.memory_space<vmem>>)
    %c0 = arith.constant 0 : index
    %c0_11 = arith.constant 0 : index
    %25 = vector.load %arg4[%c0, %c0_11] : memref<8x1xf32, #tpu.memory_space<vmem>>, vector<8x1xf32>
    %26 = vector.shape_cast %25 : vector<8x1xf32> to vector<8x1xf32>
    %27 = vector.broadcast %26 : vector<8x1xf32> to vector<8x128xf32>
    %28 = arith.index_cast %9 : i32 to index
    %c0_12 = arith.constant 0 : index
    %c0_13 = arith.constant 0 : index
    %29 = vector.load %arg6[%28, %c0_12, %c0_13] : memref<2x8x256xf32, #tpu.memory_space<vmem>>, vector<1x8x128xf32>
    %30 = vector.shape_cast %29 : vector<1x8x128xf32> to vector<8x128xf32>
    %c0_14 = arith.constant 0 : index
    %c0_15 = arith.constant 0 : index
    %c0_16 = arith.constant 0 : index
    %31 = vector.load %arg3[%c0_14, %c0_15, %c0_16] : memref<5x8x8xf32, #tpu.memory_space<vmem>>, vector<1x8x8xf32>
    %32 = vector.shape_cast %31 : vector<1x8x8xf32> to vector<8x8xf32>
    %cst = arith.constant dense<0.000000e+00> : vector<8x128xf32>
    %33 = tpu.matmul %32, %30, %cst {dimension_numbers = #tpu.dot_dimension_numbers<[1], [0], [0], [1], [0, 0, 1, 1], [], []>} : vector<8x8xf32>, vector<8x128xf32>, vector<8x128xf32> -> vector<8x128xf32>
    %34 = arith.addf %27, %33 : vector<8x128xf32>
    %35 = arith.index_cast %9 : i32 to index
    %c0_17 = arith.constant 0 : index
    %c1 = arith.constant 1 : index
    %36 = vector.load %arg6[%35, %c0_17, %c1] : memref<2x8x256xf32, #tpu.memory_space<vmem>>, vector<1x8x128xf32>
    %37 = vector.shape_cast %36 : vector<1x8x128xf32> to vector<8x128xf32>
    %c1_18 = arith.constant 1 : index
    %c0_19 = arith.constant 0 : index
    %c0_20 = arith.constant 0 : index
    %38 = vector.load %arg3[%c1_18, %c0_19, %c0_20] : memref<5x8x8xf32, #tpu.memory_space<vmem>>, vector<1x8x8xf32>
    %39 = vector.shape_cast %38 : vector<1x8x8xf32> to vector<8x8xf32>
    %cst_21 = arith.constant dense<0.000000e+00> : vector<8x128xf32>
    %40 = tpu.matmul %39, %37, %cst_21 {dimension_numbers = #tpu.dot_dimension_numbers<[1], [0], [0], [1], [0, 0, 1, 1], [], []>} : vector<8x8xf32>, vector<8x128xf32>, vector<8x128xf32> -> vector<8x128xf32>
    %41 = arith.addf %34, %40 : vector<8x128xf32>
    %42 = arith.index_cast %9 : i32 to index
    %c0_22 = arith.constant 0 : index
    %c2 = arith.constant 2 : index
    %43 = vector.load %arg6[%42, %c0_22, %c2] : memref<2x8x256xf32, #tpu.memory_space<vmem>>, vector<1x8x128xf32>
    %44 = vector.shape_cast %43 : vector<1x8x128xf32> to vector<8x128xf32>
    %c2_23 = arith.constant 2 : index
    %c0_24 = arith.constant 0 : index
    %c0_25 = arith.constant 0 : index
    %45 = vector.load %arg3[%c2_23, %c0_24, %c0_25] : memref<5x8x8xf32, #tpu.memory_space<vmem>>, vector<1x8x8xf32>
    %46 = vector.shape_cast %45 : vector<1x8x8xf32> to vector<8x8xf32>
    %cst_26 = arith.constant dense<0.000000e+00> : vector<8x128xf32>
    %47 = tpu.matmul %46, %44, %cst_26 {dimension_numbers = #tpu.dot_dimension_numbers<[1], [0], [0], [1], [0, 0, 1, 1], [], []>} : vector<8x8xf32>, vector<8x128xf32>, vector<8x128xf32> -> vector<8x128xf32>
    %48 = arith.addf %41, %47 : vector<8x128xf32>
    %49 = arith.index_cast %9 : i32 to index
    %c0_27 = arith.constant 0 : index
    %c3 = arith.constant 3 : index
    %50 = vector.load %arg6[%49, %c0_27, %c3] : memref<2x8x256xf32, #tpu.memory_space<vmem>>, vector<1x8x128xf32>
    %51 = vector.shape_cast %50 : vector<1x8x128xf32> to vector<8x128xf32>
    %c3_28 = arith.constant 3 : index
    %c0_29 = arith.constant 0 : index
    %c0_30 = arith.constant 0 : index
    %52 = vector.load %arg3[%c3_28, %c0_29, %c0_30] : memref<5x8x8xf32, #tpu.memory_space<vmem>>, vector<1x8x8xf32>
    %53 = vector.shape_cast %52 : vector<1x8x8xf32> to vector<8x8xf32>
    %cst_31 = arith.constant dense<0.000000e+00> : vector<8x128xf32>
    %54 = tpu.matmul %53, %51, %cst_31 {dimension_numbers = #tpu.dot_dimension_numbers<[1], [0], [0], [1], [0, 0, 1, 1], [], []>} : vector<8x8xf32>, vector<8x128xf32>, vector<8x128xf32> -> vector<8x128xf32>
    %55 = arith.addf %48, %54 : vector<8x128xf32>
    %56 = arith.index_cast %9 : i32 to index
    %c0_32 = arith.constant 0 : index
    %c4 = arith.constant 4 : index
    %57 = vector.load %arg6[%56, %c0_32, %c4] : memref<2x8x256xf32, #tpu.memory_space<vmem>>, vector<1x8x128xf32>
    %58 = vector.shape_cast %57 : vector<1x8x128xf32> to vector<8x128xf32>
    %c4_33 = arith.constant 4 : index
    %c0_34 = arith.constant 0 : index
    %c0_35 = arith.constant 0 : index
    %59 = vector.load %arg3[%c4_33, %c0_34, %c0_35] : memref<5x8x8xf32, #tpu.memory_space<vmem>>, vector<1x8x8xf32>
    %60 = vector.shape_cast %59 : vector<1x8x8xf32> to vector<8x8xf32>
    %cst_36 = arith.constant dense<0.000000e+00> : vector<8x128xf32>
    %61 = tpu.matmul %60, %58, %cst_36 {dimension_numbers = #tpu.dot_dimension_numbers<[1], [0], [0], [1], [0, 0, 1, 1], [], []>} : vector<8x8xf32>, vector<8x128xf32>, vector<8x128xf32> -> vector<8x128xf32>
    %62 = arith.addf %55, %61 : vector<8x128xf32>
    %c0_37 = arith.constant 0 : index
    %c0_38 = arith.constant 0 : index
    %c0_39 = arith.constant 0 : index
    %63 = vector.load %arg5[%c0_37, %c0_38, %c0_39] : memref<1x8x128xf32, #tpu.memory_space<vmem>>, vector<1x8x128xf32>
    %64 = vector.shape_cast %63 : vector<1x8x128xf32> to vector<8x128xf32>
    %65 = vector.shape_cast %62 : vector<8x128xf32> to vector<1x8x128xf32>
    tpu.vector_store %arg5[%c0_37, %c0_38, %c0_39], %65 {strides = array<i32>} : memref<1x8x128xf32, #tpu.memory_space<vmem>>, vector<1x8x128xf32>,
    return
  }
  func.func @transform_1(%arg0: i32, %arg1: i32) -> (i32, i32, i32) {
    %c0_i32 = arith.constant 0 : i32
    %c0_i32_0 = arith.constant 0 : i32
    %c0_i32_1 = arith.constant 0 : i32
    %c0_i32_2 = arith.constant 0 : i32
    return %c0_i32, %c0_i32_0, %c0_i32_1 : i32, i32, i32
  }
  func.func @transform_2(%arg0: i32, %arg1: i32) -> (i32, i32) {
    %c0_i32 = arith.constant 0 : i32
    %c0_i32_0 = arith.constant 0 : i32
    %c0_i32_1 = arith.constant 0 : i32
    return %c0_i32, %c0_i32_0 : i32, i32
  }
  func.func @transform_3(%arg0: i32, %arg1: i32) -> (i32, i32, i32) {
    %c0_i32 = arith.constant 0 : i32
    %c0_i32_0 = arith.constant 0 : i32
    return %arg0, %c0_i32, %arg1 : i32, i32, i32
  }
}

</mosaic_0001>

<bundles_post_ra>
// kernel: tpu_custom_call.1
= control target key start
LH: loop header
LB: loop body
LE: loop exit
PB: predicated region body
PF: predicated region fallthrough
CT: control target
= control target key end

     0   :  { %8 = vsyncpa [#allocation5], 0  ;;  %s1254_s0 = inlined_call_operand.hbm [shape: f32[2,8,256], index: 0, kind: input, shape index: {}]   ;;  %s1255_s1 = inlined_call_operand.hbm [shape: f32[5,8,8], index: 1, kind: input, shape index: {}]   ;;  %s1256_s2 = inlined_call_operand.vmem [shape: f32[8,1], index: 2, kind: input, shape index: {}]   ;;  %s1257_s3 = inlined_call_operand.hbm [shape: f32[2,8,128], index: 3, kind: output, shape index: {}]  }
   0x1   :  { %9 = vsyncpa [#allocation6], 0 }
   0x2   :  { %11 = vsyncpa [#allocation6 + $0x1], 0  ;;  %s1075_s12 = smov 0   ;;  %s1077_s13 = smov 0  }
   0x3   :  { %s1079_s14 = smov 0   ;;  %s1081_s15 = smov 0  }
   0x4   :  { %s1083_s16 = smov 0   ;;  %s1085_s17 = smov 0  }
   0x5 LB: > { %s760_s18 = sadd.s32 4294967295, %s1041_s17   ;;  %s761_s19 = sadd.s32 4294967294, %s1041_s17   ;;  %s1041_s17 = sphi %s1085_s17, %s17_s17   ;;  %s1037_s16 = sphi %s1083_s16, %s1275_s16   ;;  %s1033_s15 = sphi %s1081_s15, %s1274_s15   ;;  %s1029_s14 = sphi %s1079_s14, %s1273_s14   ;;  %s1025_s13 = sphi %s1077_s13, %s1272_s13   ;;  %s1021_s12 = sphi %s1075_s12, %s1271_s12  }
   0x6   : > { %s29_s20 = sadd.s32 1, %s1037_s16  ;;  %s80_s21 = sadd.s32 1, %s1029_s14 }
   0x7   : > { %p31_p0 = scmp.ge.s32.totalorder %s29_s20, 2  ;;  %p90_p1 = scmp.ne.s32.totalorder %s1029_s14, %s1025_s13 }
   0x8   : > { %p91_p2 = scmp.eq.s32.totalorder %s760_s18, 1  ;;  %p96_p3 = scmp.ne.s32.totalorder %s1025_s13, %s1021_s12 }
   0x9   : > { %s1277_s20 = smov (%p31_p0, %s29_s20), 0  ;;  %p97_p5 = scmp.eq.s32.totalorder %s761_s19, 1 }
   0xa   : > { %p1115_p4 = por %p91_p2, %p90_p1  ;;  %s75_s23 = ssub.s32 %s1037_s16, %s1277_s20 }
   0xb   : > { %p762_p6 = scmp.ge.s32.totalorder %s1041_s17, 1  ;;  %p78_p7 = scmp.eq.s32.totalorder %s75_s23, 0 }
   0xc   : > { %s1262_s22 = scalar_select %p1115_p4, 1, 0 }
   0xd   : > { %p1122_p8 = por %p97_p5, %p96_p3  ;;  %p104_p9 = scmp.lt.s32.totalorder %s1041_s17, 3 }
   0xe   : > { %s1128_s25 = scalar_select %p78_p7, %s1029_s14, %s80_s21  }
   0xf   : > { %s1263_s24 = scalar_select %p1122_p8, 1, 0 }
  0x10   : > { %p1130_p10 = pnand %p762_p6, %p104_p9  ;;  %p1134_p11 = scmp.eq.s32.totalorder %s760_s18, 0 }
  0x11   : > { %s1043_s28 = smov [#allocation4]   ;;  %s905_s6 = scalar_lea.hbm %s1255_s1, 640 }
  0x12   : > { %s1264_s26 = scalar_select %p1130_p10, 1, 0 }
  0x13   : > { %s1265_s27 = scalar_select %p1134_p11, 1, 0 }
  0x14   : > { %p834_p12 = pneg %p1130_p10  ;;  %s116_s29 = sshll.u32 %s1043_s28, 4  ;;  %s117_s29 = int_to_ptr.vmem [resolvable:$true] %s116_s29 }
  0x15   : > { %p906_p0 = scmp.ne.s32.totalorder %s1255_s1, %s905_s6  ;;  %p912_p5 = scmp.lt.u32.totalorder %s905_s6, %s1255_s1 }
  0x16   : > { %p1142_p13 = pnand %p1134_p11, %p834_p12 }
  0x18   : > { %p907_p1 = pneg %p1142_p13 }
  0x1a   : > { %p908_p2 = pnand %p907_p1, %p906_p0 }
  0x1c   : > { %p909_p3 = pneg %p908_p2 }
  0x1e   : > { %p914_p6 = pnand %p912_p5, %p909_p3 }
  0x20   : > { %917 = shalt.err (!%p914_p6)
}
  0x21   : > { %s918_s11 = scalar_lea.vmem %s117_s29, 640  ;;  %p926_p8 = scmp.lt.s32.totalorder %s117_s29, %s117_s29 }
  0x22   : > { %p919_p7 = scmp.ne.s32.totalorder %s117_s29, %s918_s11  ;;  %p927_p4 = scmp.lt.s32.totalorder %s918_s11, %s918_s11 }
  0x24   : > { %p921_p9 = pnand %p919_p7, %p907_p1  ;;  %p928_p11 = por %p927_p4, %p926_p8 }
  0x26   : > { %p922_p12 = pneg %p921_p9 }
  0x28   : > { %p929_p10 = pnand %p928_p11, %p922_p12 }
  0x2a   : > { %932 = shalt.err (!%p929_p10)
}
  0x2b   : > { %s1044_s18 = smov 128   ;;  %s1045_s19 = smov 8  }
  0x2c   : > { %837 = dma.hbm_to_vmem [thread:$0]  (!%p1142_p13), %s1255_s1, 640, %s117_s29, [#allocation5], %s1044_s18, %s1044_s18, %s1045_s19  }
  0x2d   : > { %p1267_p0 = scmp.ne.s32.totalorder %s1264_s26, 0 }
  0x2e   : > { %p1268_p2 = scmp.ne.s32.totalorder (!%p1267_p0), %s1265_s27, 0 }
  0x2f   : > { %135 = sbr.rel (%p1267_p0) target bundleno = 449 (0x1c1), region = 28 }
  0x36   : > { %1010 = dma.done.wait (%p1268_p2), [#allocation5], 640  }
  0x37   : > { %1012 = vsyncadd (%p1268_p2), [#allocation5], 4294966656  ;;  %s149_s28 = sand.u32 1, %s1025_s13   ;;  %s782_s4 = sshll.u32 %s1033_s15, 8 }
  0x38   : > { %s1172_s30 = sshll.u32 %s149_s28, 3  ;;  %s174_s29 = scalar_lea.hbm %s1254_s0, %s782_s4 }
  0x39   : > { %s1046_s26 = smov [#allocation2]   ;;  %s933_s8 = scalar_lea.hbm %s174_s29, 256 }
  0x3a   : > { %s186_s7 = sshll.u32 %s1046_s26, 4  ;;  %p934_p4 = scmp.ne.s32.totalorder %s174_s29, %s933_s8  ;;  %s187_s7 = int_to_ptr.vmem [resolvable:$true] %s186_s7 }
  0x3b   : > { %s935_s10 = scalar_lea.hbm %s1254_s0, 512  ;;  %p936_p8 = scmp.lt.u32.totalorder %s174_s29, %s1254_s0 }
  0x3c   : > { %p937_p10 = scmp.lt.u32.totalorder %s935_s10, %s933_s8  ;;  %p939_p13 = scmp.lt.u32.totalorder %s933_s8, %s174_s29 }
  0x3e   : > { %p938_p11 = por %p937_p10, %p936_p8 }
  0x40   : > { %p940_p1 = por %p939_p13, %p938_p11 }
  0x42   : > { %p941_p3 = pnand %p940_p1, %p934_p4 }
  0x44   : > { %944 = shalt.err (!%p941_p3)  }
  0x45   : > { %s945_s19 = scalar_lea.vmem %s187_s7, 256  ;;  %s949_s21 = scalar_lea.vmem %s187_s7, 512 }
  0x46   : > { %p946_p5 = scmp.ne.s32.totalorder %s187_s7, %s945_s19  ;;  %p950_p6 = scmp.lt.s32.totalorder %s187_s7, %s187_s7 }
  0x47   : > { %p951_p7 = scmp.lt.s32.totalorder %s949_s21, %s945_s19 }
  0x49   : > { %p952_p9 = por %p951_p7, %p950_p6 }
  0x4b   : > { %p953_p12 = pnand %p952_p9, %p946_p5 }
  0x4d   : > { %956 = shalt.err (!%p953_p12)  }
  0x4e   : > { %189 = dma.hbm_to_vmem [thread:$0]  %s174_s29, 256, %s187_s7, [#allocation3] }
  0x4f   : > { %s151_s23 = scalar_lea.vmem [#allocation7], %s1172_s30 }
  0x50   : > { %1013 = dma.done.wait [#allocation3], 256 }
  0x51   : > { %1014 = vsyncadd [#allocation3], 4294967040  ;;  %v1047_v0 = vmov 0.0   ;;  %vm1048_vm0 = vmmov 0   ;;  %v310_v1 = vld [vmem:[#allocation2] sm:$0xff]  ;;  %vm235_vm1 = vcmask 64512  }
  0x52   : > { %795 = vmatprep.subr.mxu1 %v1047_v0  ;;  %797 = vmatprep.mubr.msk.f32.mxu1 %vm1048_vm0, %v1047_v0  ;;  %v234_v2 = vld [vmem:[#allocation4] sm:$0xff]  ;;  %s1049_s4 = smov 125   ;;  %s1050_s5 = smov 126   ;;  %v311_v3 = vld [vmem:[#allocation2 + $0x8] sm:$0xff]  ;;  %v1052_v4 = vmov 0   ;;  %vm486_vm2 = vcmask 1022976  }
  0x53   : > { %805 = vmatprep.subr.mxu0 %v1047_v0  ;;  %807 = vmatprep.mubr.msk.f32.mxu0 %vm1048_vm0, %v1047_v0  ;;  %s1051_s6 = smov 127   ;;  %s1053_s29 = smov 124   ;;  %v227_v5 = vld [vmem:[%s1256_s2] sm:$0xff]  ;;  %vm403_vm3 = vcmask 1031168   ;;  %v398_v10 = vld [vmem:[#allocation4 + $0x10] sm:$0xff]  ;;  %vm320_vm4 = vcmask 1039360  }
  0x54   : > { %482 = vrot.lane.b32.xlu1 %v310_v1, %s1049_s4  ;;  %399 = vrot.lane.b32.xlu0 %v310_v1, %s1050_s5  ;;  %v313_v15 = vld [vmem:[#allocation4 + $0x8] sm:$0xff]  ;;  %vm569_vm5 = vcmask 1014784   ;;  %v481_v19 = vld [vmem:[#allocation4 + $0x18] sm:$0xff]  ;;  %v564_v21 = vld [vmem:[#allocation4 + $0x20] sm:$0xff]  ;;  %s777_s8 = sshll.u32 %s1033_s15, 7  ;;  %s662_s9 = sshll.u32 %s151_s23, 4  ;;  %s1205_s9 = int_to_ptr.vmem [resolvable:$true] %s662_s9 }
  0x55   : > { %796 = vmatpush3.msra.mxu1 %v310_v1  ;;  %904 = vset.pattern.permute.xlu0 %v1052_v4  ;;  %s1203_s11 = scalar_lea.hbm %s1257_s3, %s777_s8  ;;  %s648_s15 = scalar_lea.sflag [#allocation6], %s149_s28 }
  0x56   : > { %798 = vmatmul.mubr.msk.f32.vlgmr.msra.gmra.mrb[0].mxu1 %vm235_vm1, %v234_v2  ;;  %800 = vmatprep.subr.mxu1 %v1047_v0  ;;  %s957_s18 = scalar_lea.vmem %s1205_s9, 128  ;;  %p1269_p2 = scmp.ne.s32.totalorder %s1262_s22, 0 }
  0x57   : > { %802 = vmatprep.mubr.msk.f32.mxu1 %vm1048_vm0, %v1047_v0  ;;  %p958_p0 = scmp.ne.s32.totalorder %s1205_s9, %s957_s18  ;;  %s1054_s19 = smov [#allocation7]  }
  0x58   : > { %484 = vrot.lane.b32.xlu1 %v311_v3, %s1049_s4  ;;  %401 = vrot.lane.b32.xlu0 %v311_v3, %s1050_s5  ;;  %s961_s21 = sshll.u32 %s1054_s19, 4  ;;  %s962_s21 = int_to_ptr.vmem [resolvable:$false] %s961_s21 }
  0x59   : > { %p959_p4 = pnand %p958_p0, %p1269_p2  ;;  %s963_s4 = scalar_lea.vmem %s962_s21, 256 }
  0x5a   : > { %p964_p10 = scmp.lt.s32.totalorder %s1205_s9, %s962_s21  ;;  %p965_p11 = scmp.lt.s32.totalorder %s963_s4, %s957_s18 }
  0x5b   : > { %p960_p8 = pneg %p959_p4 }
  0x5c   : > { %318 = vrot.lane.b32.xlu1 %v311_v3, %s1051_s6  ;;  %316 = vrot.lane.b32.xlu0 %v310_v1, %s1051_s6  ;;  %p966_p13 = por %p965_p11, %p964_p10 }
  0x5e   : > { %p967_p1 = pnand %p966_p13, %p960_p8 }
  0x60   : > { %567 = vrot.lane.b32.xlu1 %v311_v3, %s1053_s29  ;;  %565 = vrot.lane.b32.xlu0 %v310_v1, %s1053_s29 }
  0x64   : > { %230 = vperm.xlu0 %904, %v227_v5  }
  0xc6   : > { %v483_v6 = vpop.permute.xlu1 %482  ;;  %v400_v7 = vpop.permute.xlu0 %399 }
  0xca   : > { %v485_v8 = vpop.permute.xlu1 %484  ;;  %v402_v9 = vpop.permute.xlu0 %401 }
  0xcb   : > { %v487_v11 = vsel %vm486_vm2, %v483_v6, %v485_v8  ;;  %v404_v12 = vsel %vm403_vm3, %v400_v7, %v402_v9 }
  0xcc   : > { %806 = vmatpush3.msra.mxu0 %v404_v12 }
  0xcd   : > { %808 = vmatmul.mubr.msk.f32.vlgmr.msra.gmra.mrb[0].mxu0 %vm235_vm1, %v398_v10  ;;  %810 = vmatprep.subr.mxu0 %v1047_v0 }
  0xce   : > { %811 = vmatpush3.msra.mxu0 %v487_v11  ;;  %v319_v13 = vpop.permute.xlu1 %318  ;;  %v317_v14 = vpop.permute.xlu0 %316  ;;  %812 = vmatprep.mubr.msk.f32.mxu0 %vm1048_vm0, %v1047_v0 }
  0xcf   : > { %v321_v16 = vsel %vm320_vm4, %v317_v14, %v319_v13  ;;  %815 = vmatprep.subr.mxu0 %v1047_v0 }
  0xd0   : > { %801 = vmatpush3.msra.mxu1 %v321_v16 }
  0xd1   : > { %803 = vmatmul.mubr.msk.f32.vlgmr.msra.gmra.mrb[0].mxu1 %vm235_vm1, %v313_v15 }
  0xd2   : > { %v568_v17 = vpop.permute.xlu1 %567  ;;  %v566_v18 = vpop.permute.xlu0 %565 }
  0xd3   : > { %v570_v20 = vsel %vm569_vm5, %v566_v18, %v568_v17 }
  0xd5   : > { %813 = vmatmul.mubr.msk.f32.vlgmr.msra.gmra.mrb[0].mxu0 %vm235_vm1, %v481_v19 }
  0xd6   : > { %816 = vmatpush3.msra.mxu0 %v570_v20  ;;  %817 = vmatprep.mubr.msk.f32.mxu0 %vm1048_vm0, %v1047_v0 }
  0xdd   : > { %818 = vmatmul.mubr.msk.f32.vlgmr.msra.gmra.mrb[0].mxu0 %vm235_vm1, %v564_v21 }
  0xe3   : > { %v231_v24 = vpop.permute.xlu0 %230 }
 0x1a4   : > { %v392_v22 = vpop.f32.mrb[0].mxu1 }
 0x1a5   : > { %v804_v23 = vpop.f32.mrb[1].mxu1  ;;  %v820_v25 = vadd.f32 %v392_v22, %v231_v24 }
 0x1b0   : > { %v641_v26 = vpop.f32.mrb[0].mxu0 }
 0x1b1   : > { %v821_v27 = vadd.f32 %v820_v25, %v641_v26  ;;  %v819_v28 = vpop.f32.mrb[1].mxu0 }
 0x1b3   : > { %646 = vst [vmem:[%s151_s23] sm:$0xff] %v821_v27 }
 0x1b4   : > { %970 = shalt.err (!%p967_p1)
}
 0x1b5   : > { %s971_s28 = scalar_lea.hbm %s1203_s11, 128  ;;  %s975_s5 = scalar_lea.hbm %s1257_s3, 256 }
 0x1b6   : > { %p972_p3 = scmp.ne.s32.totalorder %s1203_s11, %s971_s28  ;;  %p976_p7 = scmp.lt.u32.totalorder %s1203_s11, %s1257_s3 }
 0x1b7   : > { %p977_p9 = scmp.lt.u32.totalorder %s975_s5, %s971_s28  ;;  %p979_p0 = scmp.lt.u32.totalorder %s971_s28, %s1203_s11 }
 0x1b8   : > { %p973_p5 = pnand %p972_p3, %p1269_p2 }
 0x1b9   : > { %p978_p12 = por %p977_p9, %p976_p7 }
 0x1ba   : > { %p974_p6 = pneg %p973_p5 }
 0x1bb   : > { %p980_p4 = por %p979_p0, %p978_p12 }
 0x1bd   : > { %p981_p8 = pnand %p980_p4, %p974_p6 }
 0x1bf   : > { %984 = shalt.err (!%p981_p8)
}
 0x1c0   : > { %832 = dma.vmem_to_hbm [thread:$0]  (%p1269_p2), %s1205_s9, 128, %s1203_s11, %s648_s15  }
 0x1c1 PF: > { %p844_p10 = scmp.ge.s32.totalorder %s1041_s17, 2  ;;  %s674_s26 = sand.u32 1, %s1021_s12  }
 0x1c2   : > { %p1270_p11 = scmp.ne.s32.totalorder %s1263_s24, 0  ;;  %s675_s7 = scalar_lea.sflag [#allocation6], %s674_s26 }
 0x1c4   : > { %p839_p13 = pnand %p844_p10, %p1270_p11 }
 0x1c6   : > { %1016 = dma.done.wait (!%p839_p13), %s675_s7, 128  }
 0x1c7   : > { %1018 = vsyncadd (!%p839_p13), %s675_s7, 4294967168  ;;  %s17_s17 = sadd.s32 1, %s1041_s17   ;;  %s1271_s12 = smov %s1025_s13 }
 0x1c8   : > { %p14_p1 = scmp.ge.s32.totalorder %s17_s17, 4   ;;  %s1272_s13 = smov %s1029_s14 }
 0x1c9   : > { %s1273_s14 = smov %s1128_s25  ;;  %s1274_s15 = smov %s1037_s16 }
 0x1ca   : > { %s1275_s16 = smov %s1277_s20  ;;  %16 = sbr.rel (!%p14_p1) target bundleno = 5 (0x5), region = 94 }
 0x1d1   :  { %680 = vsyncpa [#allocation5], 1 }
 0x1d2   :  { %682 = vsyncpa [#allocation5 + $0x1], 1 }
 0x1d3   :  { %683 = vsyncpa [#allocation6], 1 }
 0x1d4   :  { %685 = vsyncpa [#allocation6 + $0x1], 1 }
 0x1d5   :  { %686 = vsyncmov [#allocation3] }
 0x1d8   :  { %s687_s22 = vpop.sfrf %686 }
 0x1d9   :  { %p780_p2 = scmp.ne.s32.totalorder %s687_s22, 0 }
 0x1db   :  { %691 = shalt.err (%p780_p2)  }
 0x1dc   :  { %693 = vsyncmov [#allocation3 + $0x1] }
 0x1df   :  { %s694_s24 = vpop.sfrf %693 }
 0x1e0   :  { %p781_p3 = scmp.ne.s32.totalorder %s694_s24, 0 }
 0x1e2   :  { %698 = shalt.err (%p781_p3)  }

</bundles_post_ra>
